<compile_context>
chip_gen: v7x
topology: tpu7x:2x2x1
jax: 0.10.0
libtpu: 0.0.40
codegen_flags: <defaults>
</compile_context>

<pallas_src>
import functools

import jax
import jax.numpy as jnp
from jax.experimental import pallas as pl
from jax.experimental.pallas import tpu as pltpu

LANE = 128  # TPU lane width


def _round_up(n, m):
    return ((n + m - 1) // m) * m


def fnn_kernel(x_ref, w1_ref, b1_ref, w2_ref, b2_ref, w3_ref, b3_ref, o_ref):
    # Fused 3-layer MLP on one batch tile: three MXU matmuls (bf16 in, f32 acc)
    # + VPU bias/ReLU in f32, all operands resident in VMEM.
    x = x_ref[...]
    z1 = jnp.dot(x, w1_ref[...], preferred_element_type=jnp.float32) + b1_ref[...]
    a1 = jnp.maximum(z1, 0.0).astype(w2_ref.dtype)
    z2 = jnp.dot(a1, w2_ref[...], preferred_element_type=jnp.float32) + b2_ref[...]
    a2 = jnp.maximum(z2, 0.0).astype(w3_ref.dtype)
    z3 = jnp.dot(a2, w3_ref[...], preferred_element_type=jnp.float32) + b3_ref[...]
    o_ref[...] = z3.astype(o_ref.dtype)


def fnn_forward(x, w1, b1, w2, b2, w3, b3, *, tb=128, compute_dtype=jnp.bfloat16):
    """x: (B, 784) f32; w*: (in, out) f32 (transpose of nn.Linear.weight); b*: (1, out)."""
    B, d_in = x.shape
    h1, h2, d_out = w1.shape[1], w2.shape[1], w3.shape[1]
    h1p, h2p, d_out_p = (_round_up(d, LANE) for d in (h1, h2, d_out))

    # ---- parameter prep: lane-pad hidden/output dims to 128, cast weights to bf16.
    w1p = jnp.pad(w1, ((0, 0), (0, h1p - h1))).astype(compute_dtype)
    b1p = jnp.pad(b1, ((0, 0), (0, h1p - h1))).astype(jnp.float32)
    w2p = jnp.pad(w2, ((0, h1p - h1), (0, h2p - h2))).astype(compute_dtype)
    b2p = jnp.pad(b2, ((0, 0), (0, h2p - h2))).astype(jnp.float32)
    w3p = jnp.pad(w3, ((0, h2p - h2), (0, d_out_p - d_out))).astype(compute_dtype)
    b3p = jnp.pad(b3, ((0, 0), (0, d_out_p - d_out))).astype(jnp.float32)

    # ---- batch tiling: round the tile and the batch up to multiples of 16 (bf16 sublane).
    tb_eff = min(tb, _round_up(B, 16))
    tb_eff = max(16, _round_up(tb_eff, 16))
    b_pad = _round_up(B, tb_eff)
    xp = x.astype(compute_dtype)
    if b_pad != B:
        xp = jnp.pad(xp, ((0, b_pad - B), (0, 0)))
    grid = (b_pad // tb_eff,)

    flops = 2 * b_pad * (d_in * h1p + h1p * h2p + h2p * d_out_p)
    bytes_accessed = (
        xp.size * xp.dtype.itemsize
        + sum(a.size * a.dtype.itemsize for a in (w1p, b1p, w2p, b2p, w3p, b3p))
        + b_pad * d_out_p * 4
    )

    # Weights/biases: same block every grid step -> DMA'd once, stay resident in VMEM.
    const = lambda shape: pl.BlockSpec(shape, lambda i: (0, 0))

    out = pl.pallas_call(
        fnn_kernel,
        out_shape=jax.ShapeDtypeStruct((b_pad, d_out_p), jnp.float32),
        grid=grid,
        in_specs=[
            pl.BlockSpec((tb_eff, d_in), lambda i: (i, 0)),   # x tile, pipelined over batch
            const(w1p.shape), const(b1p.shape),
            const(w2p.shape), const(b2p.shape),
            const(w3p.shape), const(b3p.shape),
        ],
        out_specs=pl.BlockSpec((tb_eff, d_out_p), lambda i: (i, 0)),
        compiler_params=pltpu.CompilerParams(
            dimension_semantics=("parallel",),  # shard batch across TCs (v7x megacore)
        ),
        cost_estimate=pl.CostEstimate(
            flops=flops, transcendentals=0, bytes_accessed=bytes_accessed
        ),
    )(xp, w1p, b1p, w2p, b2p, w3p, b3p)

    # Drop batch padding and lane padding (cols 10..127 are exact zeros + b3 garbage-free).
    return out[:B, :d_out]


def init_linear(key, in_dim, out_dim):
    # Deterministic init mimicking nn.Linear's U(-1/sqrt(in), 1/sqrt(in)).
    kw, kb = jax.random.split(key)
    bound = 1.0 / (in_dim ** 0.5)
    w = jax.random.uniform(kw, (in_dim, out_dim), jnp.float32, -bound, bound)
    b = jax.random.uniform(kb, (1, out_dim), jnp.float32, -bound, bound)
    return w, b


def fnn_reference(x, w1, b1, w2, b2, w3, b3):
    a1 = jnp.maximum(x @ w1 + b1, 0.0)
    a2 = jnp.maximum(a1 @ w2 + b2, 0.0)
    return a2 @ w3 + b3


if __name__ == "__main__":
    input_dim, layer1_dim, layer2_dim, layer_out = 28 * 28, 80, 40, 10
    batch = 256  # small, but exercises the batch grid (2 tiles of 128)

    key = jax.random.PRNGKey(0)
    kx, k1, k2, k3 = jax.random.split(key, 4)

    x = jax.random.normal(kx, (batch, input_dim), jnp.float32)
    w1, b1 = init_linear(k1, input_dim, layer1_dim)
    w2, b2 = init_linear(k2, layer1_dim, layer2_dim)
    w3, b3 = init_linear(k3, layer2_dim, layer_out)

    fwd = jax.jit(functools.partial(fnn_forward, tb=128))
    out = jax.block_until_ready(fwd(x, w1, b1, w2, b2, w3, b3))

    # f32 reference; tolerance accounts for the deliberate bf16 input/weight quantization.
    ref = fnn_reference(x, w1, b1, w2, b2, w3, b3)
    assert out.shape == (batch, layer_out)
    assert jnp.allclose(out, ref, atol=5e-2, rtol=5e-2), "mismatch vs JAX reference"

    print("KERNEL_OK")
</pallas_src>

<mosaic_0001>
module attributes {stable_mosaic.version = 11 : i64} {
  func.func @fnn_kernel(%arg0: i32, %arg1: memref<128x784xbf16, #tpu.memory_space<vmem>>, %arg2: memref<784x128xbf16, #tpu.memory_space<vmem>>, %arg3: memref<1x128xf32, #tpu.memory_space<vmem>>, %arg4: memref<128x128xbf16, #tpu.memory_space<vmem>>, %arg5: memref<1x128xf32, #tpu.memory_space<vmem>>, %arg6: memref<128x128xbf16, #tpu.memory_space<vmem>>, %arg7: memref<1x128xf32, #tpu.memory_space<vmem>>, %arg8: memref<128x128xf32, #tpu.memory_space<vmem>>) attributes {dimension_semantics = [#tpu.dimension_semantics<parallel>], iteration_bounds = array<i64: 2>, scalar_prefetch = 0 : i64, scratch_operands = 0 : i64, tpu.core_type = #tpu.core_type<tc>, window_params = [{transform_indices = @transform_0, window_bounds = array<i64: 128, 784>}, {pipeline_mode = #tpu.pipeline_mode<synchronous>, transform_indices = @transform_1, window_bounds = array<i64: 784, 128>}, {pipeline_mode = #tpu.pipeline_mode<synchronous>, transform_indices = @transform_2, window_bounds = array<i64: 1, 128>}, {pipeline_mode = #tpu.pipeline_mode<synchronous>, transform_indices = @transform_3, window_bounds = array<i64: 128, 128>}, {pipeline_mode = #tpu.pipeline_mode<synchronous>, transform_indices = @transform_4, window_bounds = array<i64: 1, 128>}, {pipeline_mode = #tpu.pipeline_mode<synchronous>, transform_indices = @transform_5, window_bounds = array<i64: 128, 128>}, {pipeline_mode = #tpu.pipeline_mode<synchronous>, transform_indices = @transform_6, window_bounds = array<i64: 1, 128>}, {transform_indices = @transform_7, window_bounds = array<i64: 128, 128>}]} {
    %c0 = arith.constant 0 : index
    %c0_0 = arith.constant 0 : index
    %0 = vector.load %arg1[%c0, %c0_0] : memref<128x784xbf16, #tpu.memory_space<vmem>>, vector<128x784xbf16>
    %c0_1 = arith.constant 0 : index
    %c0_2 = arith.constant 0 : index
    %1 = vector.load %arg2[%c0_1, %c0_2] : memref<784x128xbf16, #tpu.memory_space<vmem>>, vector<784x128xbf16>
    %cst = arith.constant dense<0.000000e+00> : vector<128x128xf32>
    %2 = tpu.matmul %0, %1, %cst {dimension_numbers = #tpu.dot_dimension_numbers<[1], [0], [0], [1], [0, 0, 1, 1], [], []>} : vector<128x784xbf16>, vector<784x128xbf16>, vector<128x128xf32> -> vector<128x128xf32>
    %c0_3 = arith.constant 0 : index
    %c0_4 = arith.constant 0 : index
    %3 = vector.load %arg3[%c0_3, %c0_4] : memref<1x128xf32, #tpu.memory_space<vmem>>, vector<1x128xf32>
    %4 = vector.broadcast %3 : vector<1x128xf32> to vector<128x128xf32>
    %5 = arith.addf %2, %4 : vector<128x128xf32>
    %cst_5 = arith.constant 0.000000e+00 : f32
    %6 = vector.broadcast %cst_5 : f32 to vector<128x128xf32>
    %7 = arith.maximumf %5, %6 : vector<128x128xf32>
    %8 = arith.truncf %7 : vector<128x128xf32> to vector<128x128xbf16>
    %c0_6 = arith.constant 0 : index
    %c0_7 = arith.constant 0 : index
    %9 = vector.load %arg4[%c0_6, %c0_7] : memref<128x128xbf16, #tpu.memory_space<vmem>>, vector<128x128xbf16>
    %cst_8 = arith.constant dense<0.000000e+00> : vector<128x128xf32>
    %10 = tpu.matmul %8, %9, %cst_8 {dimension_numbers = #tpu.dot_dimension_numbers<[1], [0], [0], [1], [0, 0, 1, 1], [], []>} : vector<128x128xbf16>, vector<128x128xbf16>, vector<128x128xf32> -> vector<128x128xf32>
    %c0_9 = arith.constant 0 : index
    %c0_10 = arith.constant 0 : index
    %11 = vector.load %arg5[%c0_9, %c0_10] : memref<1x128xf32, #tpu.memory_space<vmem>>, vector<1x128xf32>
    %12 = vector.broadcast %11 : vector<1x128xf32> to vector<128x128xf32>
    %13 = arith.addf %10, %12 : vector<128x128xf32>
    %cst_11 = arith.constant 0.000000e+00 : f32
    %14 = vector.broadcast %cst_11 : f32 to vector<128x128xf32>
    %15 = arith.maximumf %13, %14 : vector<128x128xf32>
    %16 = arith.truncf %15 : vector<128x128xf32> to vector<128x128xbf16>
    %c0_12 = arith.constant 0 : index
    %c0_13 = arith.constant 0 : index
    %17 = vector.load %arg6[%c0_12, %c0_13] : memref<128x128xbf16, #tpu.memory_space<vmem>>, vector<128x128xbf16>
    %cst_14 = arith.constant dense<0.000000e+00> : vector<128x128xf32>
    %18 = tpu.matmul %16, %17, %cst_14 {dimension_numbers = #tpu.dot_dimension_numbers<[1], [0], [0], [1], [0, 0, 1, 1], [], []>} : vector<128x128xbf16>, vector<128x128xbf16>, vector<128x128xf32> -> vector<128x128xf32>
    %c0_15 = arith.constant 0 : index
    %c0_16 = arith.constant 0 : index
    %19 = vector.load %arg7[%c0_15, %c0_16] : memref<1x128xf32, #tpu.memory_space<vmem>>, vector<1x128xf32>
    %20 = vector.broadcast %19 : vector<1x128xf32> to vector<128x128xf32>
    %21 = arith.addf %18, %20 : vector<128x128xf32>
    %c0_17 = arith.constant 0 : index
    %c0_18 = arith.constant 0 : index
    %22 = vector.load %arg8[%c0_17, %c0_18] : memref<128x128xf32, #tpu.memory_space<vmem>>, vector<128x128xf32>
    tpu.vector_store %arg8[%c0_17, %c0_18], %21 {strides = array<i32>} : memref<128x128xf32, #tpu.memory_space<vmem>>, vector<128x128xf32>,
    return
  }
  func.func @transform_0(%arg0: i32) -> (i32, i32) {
    %c0_i32 = arith.constant 0 : i32
    %c0_i32_0 = arith.constant 0 : i32
    return %arg0, %c0_i32 : i32, i32
  }
  func.func @transform_1(%arg0: i32) -> (i32, i32) {
    %c0_i32 = arith.constant 0 : i32
    %c0_i32_0 = arith.constant 0 : i32
    %c0_i32_1 = arith.constant 0 : i32
    return %c0_i32, %c0_i32_0 : i32, i32
  }
  func.func @transform_2(%arg0: i32) -> (i32, i32) {
    %c0_i32 = arith.constant 0 : i32
    %c0_i32_0 = arith.constant 0 : i32
    %c0_i32_1 = arith.constant 0 : i32
    return %c0_i32, %c0_i32_0 : i32, i32
  }
  func.func @transform_3(%arg0: i32) -> (i32, i32) {
    %c0_i32 = arith.constant 0 : i32
    %c0_i32_0 = arith.constant 0 : i32
    %c0_i32_1 = arith.constant 0 : i32
    return %c0_i32, %c0_i32_0 : i32, i32
  }
  func.func @transform_4(%arg0: i32) -> (i32, i32) {
    %c0_i32 = arith.constant 0 : i32
    %c0_i32_0 = arith.constant 0 : i32
    %c0_i32_1 = arith.constant 0 : i32
    return %c0_i32, %c0_i32_0 : i32, i32
  }
  func.func @transform_5(%arg0: i32) -> (i32, i32) {
    %c0_i32 = arith.constant 0 : i32
    %c0_i32_0 = arith.constant 0 : i32
    %c0_i32_1 = arith.constant 0 : i32
    return %c0_i32, %c0_i32_0 : i32, i32
  }
  func.func @transform_6(%arg0: i32) -> (i32, i32) {
    %c0_i32 = arith.constant 0 : i32
    %c0_i32_0 = arith.constant 0 : i32
    %c0_i32_1 = arith.constant 0 : i32
    return %c0_i32, %c0_i32_0 : i32, i32
  }
  func.func @transform_7(%arg0: i32) -> (i32, i32) {
    %c0_i32 = arith.constant 0 : i32
    %c0_i32_0 = arith.constant 0 : i32
    return %arg0, %c0_i32 : i32, i32
  }
}

</mosaic_0001>

<bundles_post_ra>
// kernel: fnn_forward.1
= control target key start
LH: loop header
LB: loop body
LE: loop exit
PB: predicated region body
PF: predicated region fallthrough
CT: control target
= control target key end

     0   :  { %s2574_s24 = smov 0   ;;  %s2951_s0 = inlined_call_operand.vmem [shape: bf16[256,784], index: 0, kind: input, shape index: {}]   ;;  %s2952_s1 = inlined_call_operand.vmem [shape: bf16[784,128], index: 1, kind: input, shape index: {}]   ;;  %s2953_s2 = inlined_call_operand.vmem [shape: f32[1,128], index: 2, kind: input, shape index: {}]   ;;  %s2954_s3 = inlined_call_operand.vmem [shape: bf16[128,128], index: 3, kind: input, shape index: {}]   ;;  %s2955_s4 = inlined_call_operand.vmem [shape: f32[1,128], index: 4, kind: input, shape index: {}]   ;;  %s2956_s5 = inlined_call_operand.vmem [shape: bf16[128,128], index: 5, kind: input, shape index: {}]   ;;  %s2957_s6 = inlined_call_operand.vmem [shape: f32[1,128], index: 6, kind: input, shape index: {}]   ;;  %s2958_s7 = inlined_call_operand.vmem [shape: f32[256,128], index: 7, kind: output, shape index: {}]  }
   0x1 LB: > { %s1898_s25 = sadd.s32 4294967295, %s2532_s24   ;;  %p1902_p0 = scmp.ge.s32.totalorder %s2532_s24, 1  ;;  %s2532_s24 = sphi %s2574_s24, %s17_s24  }
   0x2   : > { %p239_p1 = scmp.lt.s32.totalorder %s2532_s24, 3 }
   0x4   : > { %p240_p2 = pnand %p1902_p0, %p239_p1 }
   0x5   : > { %v2381_v0 = vld [vmem:[%s2952_s1 + $0x40] sm:$0xff] (!%p240_p2)   ;;  %v2385_v4 = vld [vmem:[%s2952_s1 + $0x48] sm:$0xff] (!%p240_p2)   ;;  %v2389_v8 = vld [vmem:[%s2952_s1 + $0x50] sm:$0xff] (!%p240_p2)   ;;  %s1903_s12 = sshll.u32 (!%p240_p2), %s1898_s25, 4  ;;  %vm1029_vm0 = vcmask (!%p240_p2), 130048  }
   0x6   : > { %243 = sbr.rel (%p240_p2) target bundleno = 816 (0x330), region = 48  ;;  %v2382_v1 = vld [vmem:[%s2952_s1 + $0xc0] sm:$0xff] (!%p240_p2)   ;;  %2041 = vmatprep.subr.bf16.mxu0 (!%p240_p2), %v2381_v0  ;;  %v2386_v5 = vld [vmem:[%s2952_s1 + $0xc8] sm:$0xff] (!%p240_p2)   ;;  %v2390_v9 = vld [vmem:[%s2952_s1 + $0xd0] sm:$0xff] (!%p240_p2)   ;;  %p273_p3 = scmp.lt.s32.totalorder (!%p240_p2), %s1903_s12, 31 }
   0x7   : > { %v2383_v2 = vld [vmem:[%s2952_s1] sm:$0xff] (!%p240_p2)   ;;  %2105 = vmatprep.subr.bf16.mxu1 (!%p240_p2), %v2382_v1  ;;  %v2387_v6 = vld [vmem:[%s2952_s1 + $0x8] sm:$0xff] (!%p240_p2)   ;;  %v2391_v10 = vld [vmem:[%s2952_s1 + $0x10] sm:$0xff] (!%p240_p2)  }
   0x8   : > { %v2384_v3 = vld [vmem:[%s2952_s1 + $0x80] sm:$0xff] (!%p240_p2)   ;;  %2042 = vmatpush3.bf16.msra.mxu0 (!%p240_p2), %v2383_v2  ;;  %v2388_v7 = vld [vmem:[%s2952_s1 + $0x88] sm:$0xff] (!%p240_p2)   ;;  %v2392_v11 = vld [vmem:[%s2952_s1 + $0x90] sm:$0xff] (!%p240_p2)  }
   0x9   : > { %2106 = vmatpush3.bf16.msra.mxu1 (!%p240_p2), %v2384_v3  ;;  %2043 = vmatprep.subr.bf16.mxu0 (!%p240_p2), %v2385_v4  ;;  %v2393_v12 = vld [vmem:[%s2952_s1 + $0x58] sm:$0xff] (!%p240_p2)   ;;  %v2397_v16 = vld [vmem:[%s2952_s1 + $0x60] sm:$0xff] (!%p240_p2)   ;;  %v2401_v20 = vld [vmem:[%s2952_s1 + $0x68] sm:$0xff] (!%p240_p2)  }
   0xa   : > { %2107 = vmatprep.subr.bf16.mxu1 (!%p240_p2), %v2386_v5  ;;  %v2394_v13 = vld [vmem:[%s2952_s1 + $0xd8] sm:$0xff] (!%p240_p2)   ;;  %v2398_v17 = vld [vmem:[%s2952_s1 + $0xe0] sm:$0xff] (!%p240_p2)   ;;  %v2402_v21 = vld [vmem:[%s2952_s1 + $0xe8] sm:$0xff] (!%p240_p2)  }
   0xb   : > { %v2395_v14 = vld [vmem:[%s2952_s1 + $0x18] sm:$0xff] (!%p240_p2)   ;;  %v2399_v18 = vld [vmem:[%s2952_s1 + $0x20] sm:$0xff] (!%p240_p2)   ;;  %v2403_v22 = vld [vmem:[%s2952_s1 + $0x28] sm:$0xff] (!%p240_p2)  }
   0xc   : > { %2044 = vmatpush3.bf16.msra.mxu0 (!%p240_p2), %v2387_v6  ;;  %v2396_v15 = vld [vmem:[%s2952_s1 + $0x98] sm:$0xff] (!%p240_p2)   ;;  %v2400_v19 = vld [vmem:[%s2952_s1 + $0xa0] sm:$0xff] (!%p240_p2)   ;;  %v2404_v23 = vld [vmem:[%s2952_s1 + $0xa8] sm:$0xff] (!%p240_p2)  }
   0xd   : > { %2108 = vmatpush3.bf16.msra.mxu1 %v2388_v7  ;;  %2045 = vmatprep.subr.bf16.mxu0 %v2389_v8  ;;  %s2960_s12 = smov (!%p273_p3, %s1903_s12), 31  ;;  %v2405_v24 = vld [vmem:[%s2952_s1 + $0x70] sm:$0xff]   ;;  %v2409_v28 = vld [vmem:[%s2952_s1 + $0x78] sm:$0xff]   ;;  %v2419_v36 = vld [vmem:[%s2952_s1 + $0x140] sm:$0xff]  }
   0xe   : > { %2109 = vmatprep.subr.bf16.mxu1 %v2390_v9  ;;  %v2406_v25 = vld [vmem:[%s2952_s1 + $0xf0] sm:$0xff]   ;;  %s2372_s14 = smul.u32 28, %s2960_s12  ;;  %v2410_v29 = vld [vmem:[%s2952_s1 + $0xf8] sm:$0xff]   ;;  %v2420_v37 = vld [vmem:[%s2952_s1 + $0x100] sm:$0xff]   ;;  %s1906_s17 = sshll.u32 %s2960_s12, 3 }
   0xf   : > { %v2407_v26 = vld [vmem:[%s2952_s1 + $0x30] sm:$0xff]   ;;  %v2411_v30 = vld [vmem:[%s2952_s1 + $0x38] sm:$0xff]   ;;  %v2427_v42 = vld [vmem:[%s2952_s1 + $0x148] sm:$0xff]   ;;  %s2930_s21 = scalar_lea.vmem %s2958_s7, %s1906_s17 }
  0x10   : > { %2046 = vmatpush3.bf16.msra.mxu0 %v2391_v10  ;;  %v2408_v27 = vld [vmem:[%s2952_s1 + $0xb0] sm:$0xff]   ;;  %s2680_s26 = scalar_lea.vmem %s2951_s0, %s2372_s14  ;;  %v2412_v31 = vld [vmem:[%s2952_s1 + $0xb8] sm:$0xff]   ;;  %v2428_v43 = vld [vmem:[%s2952_s1 + $0x108] sm:$0xff]  }
  0x11   : > { %2110 = vmatpush3.bf16.msra.mxu1 %v2392_v11  ;;  %2047 = vmatprep.subr.bf16.mxu0 %v2393_v12  ;;  %v2413_v32 = vld [vmem:[%s2680_s26] ss:$28 sps:$4 sm:$0xff]   ;;  %v2416_v34 = vld [vmem:[%s2680_s26 + $0x8] ss:$28 sps:$4 sm:$0xff]   ;;  %v2425_v40 = vld [vmem:[%s2680_s26 + $0x38] ss:$28 sps:$4 sm:$0xff]  }
  0x12   : > { %2111 = vmatprep.subr.bf16.mxu1 %v2394_v13  ;;  %v2415_v33 = vld [vmem:[%s2680_s26 + $0x4] ss:$28 sps:$4 sm:$0xff]   ;;  %v2418_v35 = vld [vmem:[%s2680_s26 + $0xc] ss:$28 sps:$4 sm:$0xff]   ;;  %v2421_v38 = vld [vmem:[%s2680_s26 + $0x3c] ss:$28 sps:$4 sm:$0xff]  }
  0x13   : > { %1086 = vmatprep.mubr.bf16.mxu0 %v2415_v33  ;;  %1183 = vmatprep.mubr.bf16.mxu1 %v2418_v35  ;;  %v2423_v39 = vld [vmem:[%s2680_s26 + $0x44] ss:$28 sps:$4 sm:$0xff]   ;;  %v2429_v44 = vld [vmem:[%s2680_s26 + $0x74] ss:$28 sps:$4 sm:$0xff]   ;;  %v2431_v45 = vld [vmem:[%s2680_s26 + $0x7c] ss:$28 sps:$4 sm:$0xff]  }
  0x14   : > { %2048 = vmatpush3.bf16.msra.mxu0 %v2395_v14  ;;  %v2426_v41 = vld [vmem:[%s2680_s26 + $0x40] ss:$28 sps:$4 sm:$0xff]   ;;  %v2435_v46 = vld [vmem:[%s2952_s1 + $0x150] sm:$0xff]   ;;  %v2437_v50 = vld [vmem:[%s2680_s26 + $0xac] ss:$28 sps:$4 sm:$0xff]  }
  0x15   : > { %2112 = vmatpush3.bf16.msra.mxu1 %v2396_v15  ;;  %2049 = vmatprep.subr.bf16.mxu0 %v2397_v16  ;;  %v2436_v47 = vld [vmem:[%s2952_s1 + $0x110] sm:$0xff]   ;;  %v2443_v52 = vld [vmem:[%s2952_s1 + $0x158] sm:$0xff]   ;;  %v2451_v54 = vld [vmem:[%s2952_s1 + $0x160] sm:$0xff]  }
  0x16   : > { %2113 = vmatprep.subr.bf16.mxu1 %v2398_v17  ;;  %v2433_v48 = vld [vmem:[%s2680_s26 + $0x70] ss:$28 sps:$4 sm:$0xff]   ;;  %v2434_v49 = vld [vmem:[%s2680_s26 + $0x78] ss:$28 sps:$4 sm:$0xff]   ;;  %v2452_v55 = vld [vmem:[%s2952_s1 + $0x120] sm:$0xff]  }
  0x17   : > { %v2439_v51 = vld [vmem:[%s2680_s26 + $0xb4] ss:$28 sps:$4 sm:$0xff]   ;;  %v2444_v53 = vld [vmem:[%s2952_s1 + $0x118] sm:$0xff]   ;;  %v2441_v56 = vld [vmem:[%s2680_s26 + $0xa8] ss:$28 sps:$4 sm:$0xff]  }
  0x18   : > { %2050 = vmatpush3.bf16.msra.mxu0 %v2399_v18  ;;  %v2442_v57 = vld [vmem:[%s2680_s26 + $0xb0] ss:$28 sps:$4 sm:$0xff]   ;;  %v2445_v58 = vld [vmem:[%s2680_s26 + $0xe4] ss:$28 sps:$4 sm:$0xff]   ;;  %v2453_v2 = vld [vmem:[%s2680_s26 + $0x11c] ss:$28 sps:$4 sm:$0xff]  }
  0x19   : > { %2114 = vmatpush3.bf16.msra.mxu1 %v2400_v19  ;;  %2051 = vmatprep.subr.bf16.mxu0 %v2401_v20  ;;  %v2447_v59 = vld [vmem:[%s2680_s26 + $0xec] ss:$28 sps:$4 sm:$0xff]   ;;  %v2449_v62 = vld [vmem:[%s2680_s26 + $0xe0] ss:$28 sps:$4 sm:$0xff]   ;;  %v2467_v0 = vld [vmem:[%s2952_s1 + $0x170] sm:$0xff]  }
  0x1a   : > { %2115 = vmatprep.subr.bf16.mxu1 %v2402_v21  ;;  %v2459_v60 = vld [vmem:[%s2952_s1 + $0x168] sm:$0xff]   ;;  %v2468_v1 = vld [vmem:[%s2952_s1 + $0x130] sm:$0xff]   ;;  %v2455_v3 = vld [vmem:[%s2680_s26 + $0x124] ss:$28 sps:$4 sm:$0xff]  }
  0x1b   : > { %v2460_v61 = vld [vmem:[%s2952_s1 + $0x128] sm:$0xff]   ;;  %v2475_v4 = vld [vmem:[%s2952_s1 + $0x178] sm:$0xff]   ;;  %v2461_v8 = vld [vmem:[%s2680_s26 + $0x154] ss:$28 sps:$4 sm:$0xff]  }
  0x1c   : > { %2052 = vmatpush3.bf16.msra.mxu0 %v2403_v22  ;;  %v2450_v63 = vld [vmem:[%s2680_s26 + $0xe8] ss:$28 sps:$4 sm:$0xff]   ;;  %v2476_v5 = vld [vmem:[%s2952_s1 + $0x138] sm:$0xff]   ;;  %v2465_v11 = vld [vmem:[%s2680_s26 + $0x150] ss:$28 sps:$4 sm:$0xff]  }
  0x1d   : > { %2116 = vmatpush3.bf16.msra.mxu1 %v2404_v23  ;;  %2053 = vmatprep.subr.bf16.mxu0 %v2405_v24  ;;  %v2457_v6 = vld [vmem:[%s2680_s26 + $0x118] ss:$28 sps:$4 sm:$0xff]   ;;  %v2458_v7 = vld [vmem:[%s2680_s26 + $0x120] ss:$28 sps:$4 sm:$0xff]   ;;  %v2469_v13 = vld [vmem:[%s2680_s26 + $0x18c] ss:$28 sps:$4 sm:$0xff]  }
  0x1e   : > { %2117 = vmatprep.subr.bf16.mxu1 %v2406_v25  ;;  %v2463_v9 = vld [vmem:[%s2680_s26 + $0x15c] ss:$28 sps:$4 sm:$0xff]   ;;  %v2489_v10 = vld [vmem:[%s2952_s1 + $0x180] sm:$0xff]   ;;  %v2471_v14 = vld [vmem:[%s2680_s26 + $0x194] ss:$28 sps:$4 sm:$0xff]  }
  0x1f   : > { %v2466_v12 = vld [vmem:[%s2680_s26 + $0x158] ss:$28 sps:$4 sm:$0xff]   ;;  %v2473_v15 = vld [vmem:[%s2680_s26 + $0x188] ss:$28 sps:$4 sm:$0xff]   ;;  %v2474_v16 = vld [vmem:[%s2680_s26 + $0x190] ss:$28 sps:$4 sm:$0xff]  }
  0x20   : > { %2054 = vmatpush3.bf16.msra.mxu0 %v2407_v26  ;;  %v2479_v17 = vld [vmem:[%s2680_s26 + $0x14] ss:$28 sps:$4 sm:$0xff]   ;;  %v2482_v18 = vld [vmem:[%s2680_s26 + $0x164] ss:$28 sps:$4 sm:$0xff]   ;;  %v2483_v21 = vld [vmem:[%s2680_s26 + $0x4c] ss:$28 sps:$4 sm:$0xff]  }
  0x21   : > { %2118 = vmatpush3.bf16.msra.mxu1 %v2408_v27  ;;  %2055 = vmatprep.subr.bf16.mxu0 %v2409_v28  ;;  %v2477_v19 = vld [vmem:[%s2680_s26 + $0x10] ss:$28 sps:$4 sm:$0xff]   ;;  %v2480_v20 = vld [vmem:[%s2680_s26 + $0x160] ss:$28 sps:$4 sm:$0xff]   ;;  %v2487_v23 = vld [vmem:[%s2680_s26 + $0x48] ss:$28 sps:$4 sm:$0xff]  }
  0x22   : > { %2119 = vmatprep.subr.bf16.mxu1 %v2410_v29  ;;  %v2485_v22 = vld [vmem:[%s2680_s26 + $0x19c] ss:$28 sps:$4 sm:$0xff]   ;;  %v2490_v25 = vld [vmem:[%s2680_s26 + $0x84] ss:$28 sps:$4 sm:$0xff]   ;;  %v2494_v28 = vld [vmem:[%s2680_s26 + $0x50] ss:$28 sps:$4 sm:$0xff]  }
  0x23   : > { %v2488_v24 = vld [vmem:[%s2680_s26 + $0x198] ss:$28 sps:$4 sm:$0xff]   ;;  %v2493_v27 = vld [vmem:[%s2680_s26 + $0x80] ss:$28 sps:$4 sm:$0xff]   ;;  %v2503_v35 = vld [vmem:[%s2680_s26 + $0xf0] ss:$28 sps:$4 sm:$0xff]  }
  0x24   : > { %2056 = vmatpush3.bf16.msra.mxu0 %v2411_v30  ;;  %v2492_v26 = vld [vmem:[%s2680_s26 + $0x18] ss:$28 sps:$4 sm:$0xff]   ;;  %v2497_v30 = vld [vmem:[%s2680_s26 + $0x88] ss:$28 sps:$4 sm:$0xff]  }
  0x25   : > { %2120 = vmatpush3.bf16.msra.mxu1 %v2412_v31  ;;  %2169 = vmatprep.subr.bf16.mxu0 %v2419_v36  ;;  %v2495_v29 = vld [vmem:[%s2680_s26 + $0xbc] ss:$28 sps:$4 sm:$0xff]   ;;  %v2500_v33 = vld [vmem:[%s2680_s26 + $0xf4] ss:$28 sps:$4 sm:$0xff]  }
  0x26   : > { %2356 = vmatprep.subr.bf16.mxu1 %v2419_v36  ;;  %v2498_v31 = vld [vmem:[%s2680_s26 + $0xb8] ss:$28 sps:$4 sm:$0xff]   ;;  %v2504_v36 = vld [vmem:[%s2680_s26 + $0x130] ss:$28 sps:$4 sm:$0xff]  }
  0x27   : > { %1087 = vmatmul.mubr.bf16.vlgmr.msra.gmra.mrb[0].mxu0 %v2413_v32  ;;  %v2499_v32 = vld [vmem:[%s2680_s26 + $0xc0] ss:$28 sps:$4 sm:$0xff]  }
  0x28   : > { %1184 = vmatmul.mubr.bf16.vlgmr.msra.gmra.mrb[0].mxu1 %v2416_v34  ;;  %2170 = vmatpush3.bf16.msra.mxu0 %v2420_v37  ;;  %v2502_v34 = vld [vmem:[%s2680_s26 + $0xf8] ss:$28 sps:$4 sm:$0xff]  }
  0x29   : > { %1094 = vmatprep.mubr.bf16.mxu0 %v2421_v38  ;;  %2364 = vmatpush3.bf16.msra.mxu1 %v2420_v37  ;;  %v2505_v37 = vld [vmem:[%s2680_s26 + $0x12c] ss:$28 sps:$4 sm:$0xff]  }
  0x2a   : > { %1191 = vmatprep.mubr.bf16.mxu1 %v2423_v39  ;;  %2171 = vmatprep.subr.bf16.mxu0 %v2427_v42  ;;  %v2507_v38 = vld [vmem:[%s2680_s26 + $0x168] ss:$28 sps:$4 sm:$0xff]  }
  0x2b   : > { %2357 = vmatprep.subr.bf16.mxu1 %v2427_v42  ;;  %v2508_v39 = vld [vmem:[%s2680_s26 + $0x128] ss:$28 sps:$4 sm:$0xff]  }
  0x2c   : > { %2172 = vmatpush3.bf16.msra.mxu0 %v2428_v43  ;;  %v2511_v42 = vld [vmem:[%s2954_s3 + $0x8] sm:$0xff]  }
  0x2d   : > { %2365 = vmatpush3.bf16.msra.mxu1 %v2428_v43  ;;  %2173 = vmatprep.subr.bf16.mxu0 %v2435_v46  ;;  %v2512_v43 = vld [vmem:[%s2954_s3 + $0x10] sm:$0xff]  }
  0x2e   : > { %2358 = vmatprep.subr.bf16.mxu1 %v2435_v46  ;;  %v2515_v46 = vld [vmem:[%s2954_s3 + $0x28] sm:$0xff]  }
  0x2f   : > { %1095 = vmatmul.mubr.bf16.gmra.mrb[4].mxu0 %v2425_v40  ;;  %v2509_v40 = vld [vmem:[%s2680_s26 + $0x1a0] ss:$28 sps:$4 sm:$0xff]  }
  0x30   : > { %1192 = vmatmul.mubr.bf16.gmra.mrb[4].mxu1 %v2426_v41  ;;  %1102 = vmatprep.mubr.bf16.mxu0 %v2429_v44  ;;  %v2510_v41 = vld [vmem:[%s2954_s3] sm:$0xff]   ;;  %v2513_v44 = vld [vmem:[%s2954_s3 + $0x18] sm:$0xff]  }
  0x31   : > { %1199 = vmatprep.mubr.bf16.mxu1 %v2431_v45  ;;  %2174 = vmatpush3.bf16.msra.mxu0 %v2436_v47  ;;  %v2514_v45 = vld [vmem:[%s2954_s3 + $0x20] sm:$0xff]  }
  0x32   : > { %2366 = vmatpush3.bf16.msra.mxu1 %v2436_v47  ;;  %2175 = vmatprep.subr.bf16.mxu0 %v2443_v52  ;;  %v2516_v47 = vld [vmem:[%s2954_s3 + $0x30] sm:$0xff]  }
  0x33   : > { %2359 = vmatprep.subr.bf16.mxu1 %v2443_v52  ;;  %v2836_v52 = vld [vmem:[%s2953_s2] ss:$0 sm:$0xff] }
  0x35   : > { %2176 = vmatpush3.bf16.msra.mxu0 %v2444_v53 }
  0x36   : > { %2367 = vmatpush3.bf16.msra.mxu1 %v2444_v53  ;;  %2177 = vmatprep.subr.bf16.mxu0 %v2451_v54 }
  0x37   : > { %1103 = vmatmul.mubr.bf16.gmra.mrb[8].mxu0 %v2433_v48  ;;  %2360 = vmatprep.subr.bf16.mxu1 %v2451_v54  ;;  %v2517_v48 = vld [vmem:[%s2954_s3 + $0x38] sm:$0xff]  }
  0x38   : > { %1200 = vmatmul.mubr.bf16.gmra.mrb[8].mxu1 %v2434_v49  ;;  %1110 = vmatprep.mubr.bf16.mxu0 %v2437_v50  ;;  %v2518_v49 = vld [vmem:[%s2956_s5] sm:$0xff]   ;;  %v2519_v50 = vld [vmem:[%s2956_s5 + $0x8] sm:$0xff]  }
  0x39   : > { %1207 = vmatprep.mubr.bf16.mxu1 %v2439_v51  ;;  %2178 = vmatpush3.bf16.msra.mxu0 %v2452_v55 }
  0x3a   : > { %2368 = vmatpush3.bf16.msra.mxu1 %v2452_v55  ;;  %2179 = vmatprep.subr.bf16.mxu0 %v2459_v60 }
  0x3b   : > { %2361 = vmatprep.subr.bf16.mxu1 %v2459_v60 }
  0x3d   : > { %2180 = vmatpush3.bf16.msra.mxu0 %v2460_v61 }
  0x3e   : > { %2369 = vmatpush3.bf16.msra.mxu1 %v2460_v61  ;;  %2181 = vmatprep.subr.bf16.mxu0 %v2467_v0  ;;  %v2520_v61 = vld [vmem:[%s2956_s5 + $0x10] sm:$0xff]  }
  0x3f   : > { %1111 = vmatmul.mubr.bf16.gmra.mrb[12].mxu0 %v2441_v56  ;;  %2362 = vmatprep.subr.bf16.mxu1 %v2467_v0 }
  0x40   : > { %1208 = vmatmul.mubr.bf16.gmra.mrb[12].mxu1 %v2442_v57  ;;  %1118 = vmatprep.mubr.bf16.mxu0 %v2445_v58 }
  0x41   : > { %1215 = vmatprep.mubr.bf16.mxu1 %v2447_v59  ;;  %2182 = vmatpush3.bf16.msra.mxu0 %v2468_v1 }
  0x42   : > { %2370 = vmatpush3.bf16.msra.mxu1 %v2468_v1  ;;  %2183 = vmatprep.subr.bf16.mxu0 %v2475_v4 }
  0x43   : > { %2363 = vmatprep.subr.bf16.mxu1 %v2475_v4  ;;  %v2521_v4 = vld [vmem:[%s2956_s5 + $0x18] sm:$0xff]  }
  0x45   : > { %2184 = vmatpush3.bf16.msra.mxu0 %v2476_v5 }
  0x46   : > { %2371 = vmatpush3.bf16.msra.mxu1 %v2476_v5  ;;  %2324 = vmatprep.subr.bf16.mxu0 %v2518_v49 }
  0x47   : > { %1119 = vmatmul.mubr.bf16.gmra.mrb[16].mxu0 %v2449_v62  ;;  %2274 = vmatprep.subr.bf16.mxu1 %v2489_v10 }
  0x48   : > { %1216 = vmatmul.mubr.bf16.gmra.mrb[16].mxu1 %v2450_v63  ;;  %1126 = vmatprep.mubr.bf16.mxu0 %v2453_v2 }
  0x49   : > { %1223 = vmatprep.mubr.bf16.mxu1 %v2455_v3 }
  0x4f   : > { %1127 = vmatmul.mubr.bf16.gmra.mrb[20].mxu0 %v2457_v6 }
  0x50   : > { %1224 = vmatmul.mubr.bf16.gmra.mrb[20].mxu1 %v2458_v7  ;;  %1134 = vmatprep.mubr.bf16.mxu0 %v2461_v8 }
  0x51   : > { %1231 = vmatprep.mubr.bf16.mxu1 %v2463_v9 }
  0x57   : > { %1135 = vmatmul.mubr.bf16.gmra.mrb[24].mxu0 %v2465_v11 }
  0x58   : > { %1232 = vmatmul.mubr.bf16.gmra.mrb[24].mxu1 %v2466_v12  ;;  %1142 = vmatprep.mubr.bf16.mxu0 %v2469_v13 }
  0x59   : > { %1239 = vmatprep.mubr.bf16.mxu1 %v2471_v14 }
  0x5f   : > { %1143 = vmatmul.mubr.bf16.gmra.mrb[28].mxu0 %v2473_v15  ;;  %v2522_v15 = vld [vmem:[%s2956_s5 + $0x20] sm:$0xff]  }
  0x60   : > { %1240 = vmatmul.mubr.bf16.gmra.mrb[28].mxu1 %v2474_v16  ;;  %1280 = vmatprep.mubr.bf16.mxu0 %v2479_v17 }
  0x61   : > { %1328 = vmatprep.mubr.bf16.mxu1 %v2482_v18 }
  0x67   : > { %1281 = vmatmul.mubr.bf16.vlgmr.msra.gmra.mrb[32].mxu0 %v2477_v19 }
  0x68   : > { %1329 = vmatmul.mubr.bf16.vlgmr.msra.gmra.mrb[32].mxu1 %v2480_v20  ;;  %1288 = vmatprep.mubr.bf16.mxu0 %v2483_v21 }
  0x69   : > { %1336 = vmatprep.mubr.bf16.mxu1 %v2485_v22  ;;  %2275 = vmatpush3.bf16.msra.mxu1 %v2489_v10  ;;  %v2523_v22 = vld [vmem:[%s2956_s5 + $0x28] sm:$0xff]  }
  0x6a   : > { %2292 = vmatprep.subr.bf16.mxu1 %v2510_v41  ;;  %2325 = vmatpush3.bf16.msra.mxu0 %v2518_v49 }
  0x6b   : > { %2326 = vmatprep.subr.bf16.mxu0 %v2519_v50 }
  0x6e   : > { %2327 = vmatpush3.bf16.msra.mxu0 %v2519_v50 }
  0x6f   : > { %1289 = vmatmul.mubr.bf16.gmra.mrb[36].mxu0 %v2487_v23  ;;  %2328 = vmatprep.subr.bf16.mxu0 %v2520_v61 }
  0x70   : > { %1337 = vmatmul.mubr.bf16.gmra.mrb[36].mxu1 %v2488_v24  ;;  %1296 = vmatprep.mubr.bf16.mxu0 %v2490_v25 }
  0x71   : > { %2276 = vmatprep.mubr.msk.bf16.mxu1 %vm1029_vm0, %v2492_v26 }
  0x72   : > { %2329 = vmatpush3.bf16.msra.mxu0 %v2520_v61 }
  0x73   : > { %2330 = vmatprep.subr.bf16.mxu0 %v2521_v4 }
  0x76   : > { %2331 = vmatpush3.bf16.msra.mxu0 %v2521_v4 }
  0x77   : > { %1297 = vmatmul.mubr.bf16.gmra.mrb[40].mxu0 %v2493_v27  ;;  %2332 = vmatprep.subr.bf16.mxu0 %v2522_v15 }
  0x78   : > { %2277 = vmatmul.mubr.msk.bf16.vlgmr.msra.gmra.mrb[40].mxu1 %vm1029_vm0, %v2494_v28  ;;  %1304 = vmatprep.mubr.bf16.mxu0 %v2495_v29 }
  0x79   : > { %2280 = vmatprep.mubr.msk.bf16.mxu1 %vm1029_vm0, %v2497_v30  ;;  %2293 = vmatpush3.bf16.msra.mxu1 %v2510_v41 }
  0x7a   : > { %2294 = vmatprep.subr.bf16.mxu1 %v2511_v42  ;;  %2333 = vmatpush3.bf16.msra.mxu0 %v2522_v15 }
  0x7b   : > { %2334 = vmatprep.subr.bf16.mxu0 %v2523_v22 }
  0x7d   : > { %2295 = vmatpush3.bf16.msra.mxu1 %v2511_v42 }
  0x7e   : > { %2296 = vmatprep.subr.bf16.mxu1 %v2512_v43  ;;  %2335 = vmatpush3.bf16.msra.mxu0 %v2523_v22 }
  0x7f   : > { %1305 = vmatmul.mubr.bf16.gmra.mrb[44].mxu0 %v2498_v31 }
  0x80   : > { %2281 = vmatmul.mubr.msk.bf16.gmra.mrb[44].mxu1 %vm1029_vm0, %v2499_v32  ;;  %1312 = vmatprep.mubr.bf16.mxu0 %v2500_v33 }
  0x81   : > { %2284 = vmatprep.mubr.msk.bf16.mxu1 %vm1029_vm0, %v2502_v34  ;;  %2297 = vmatpush3.bf16.msra.mxu1 %v2512_v43 }
  0x82   : > { %2298 = vmatprep.subr.bf16.mxu1 %v2513_v44 }
  0x85   : > { %2299 = vmatpush3.bf16.msra.mxu1 %v2513_v44 }
  0x86   : > { %2300 = vmatprep.subr.bf16.mxu1 %v2514_v45 }
  0x87   : > { %1313 = vmatmul.mubr.bf16.gmra.mrb[48].mxu0 %v2503_v35 }
  0x88   : > { %2285 = vmatmul.mubr.msk.bf16.gmra.mrb[48].mxu1 %vm1029_vm0, %v2504_v36  ;;  %1320 = vmatprep.mubr.bf16.mxu0 %v2505_v37 }
  0x89   : > { %2288 = vmatprep.mubr.msk.bf16.mxu1 %vm1029_vm0, %v2507_v38  ;;  %2301 = vmatpush3.bf16.msra.mxu1 %v2514_v45 }
  0x8a   : > { %2302 = vmatprep.subr.bf16.mxu1 %v2515_v46 }
  0x8d   : > { %2303 = vmatpush3.bf16.msra.mxu1 %v2515_v46 }
  0x8e   : > { %2304 = vmatprep.subr.bf16.mxu1 %v2516_v47 }
  0x8f   : > { %1321 = vmatmul.mubr.bf16.gmra.mrb[52].mxu0 %v2508_v39 }
  0x90   : > { %2289 = vmatmul.mubr.msk.bf16.gmra.mrb[52].mxu1 %vm1029_vm0, %v2509_v40 }
  0x91   : > { %2305 = vmatpush3.bf16.msra.mxu1 %v2516_v47 }
  0x92   : > { %2306 = vmatprep.subr.bf16.mxu1 %v2517_v48 }
  0x95   : > { %2307 = vmatpush3.bf16.msra.mxu1 %v2517_v48 }
  0xfa   : > { %v2057_v51 = vpop.f32.mrb[0].mxu0 }
  0xfb   : > { %v2058_v53 = vpop.f32.mrb[1].mxu0  ;;  %v2121_v54 = vpop.f32.mrb[0].mxu1 }
  0xfc   : > { %v2059_v55 = vadd.f32 %v2058_v53, %v2057_v51  ;;  %v2060_v56 = vpop.f32.mrb[2].mxu0  ;;  %v2122_v57 = vpop.f32.mrb[1].mxu1 }
  0xfd   : > { %v2061_v58 = vpop.f32.mrb[3].mxu0  ;;  %v2123_v59 = vadd.f32 %v2122_v57, %v2121_v54  ;;  %v2124_v60 = vpop.f32.mrb[2].mxu1 }
  0xfe   : > { %v1089_v62 = vadd.f32 %v2059_v55, %v2836_v52  ;;  %v2062_v63 = vadd.f32 %v2061_v58, %v2060_v56  ;;  %v2125_v0 = vpop.f32.mrb[3].mxu1 }
  0xff   : > { %v2126_v1 = vadd.f32 %v2125_v0, %v2124_v60 }
 0x100   : > { %v1092_v2 = vadd.f32 %v2062_v63, %v2836_v52  ;;  %v2843_v3 = vadd.f32 %v2123_v59, %v1089_v62 }
 0x102   : > { %v2848_v5 = vadd.f32 %v2126_v1, %v1092_v2  ;;  %v2063_v6 = vpop.f32.mrb[4].mxu0 }
 0x103   : > { %v2064_v7 = vpop.f32.mrb[5].mxu0  ;;  %v2127_v8 = vpop.f32.mrb[4].mxu1 }
 0x104   : > { %v2065_v9 = vadd.f32 %v2064_v7, %v2063_v6  ;;  %v2066_v10 = vpop.f32.mrb[6].mxu0  ;;  %v2128_v11 = vpop.f32.mrb[5].mxu1 }
 0x105   : > { %v2067_v12 = vpop.f32.mrb[7].mxu0  ;;  %v2129_v13 = vadd.f32 %v2128_v11, %v2127_v8  ;;  %v2130_v14 = vpop.f32.mrb[6].mxu1 }
 0x106   : > { %v1097_v16 = vadd.f32 %v2065_v9, %v2836_v52  ;;  %v2068_v17 = vadd.f32 %v2067_v12, %v2066_v10  ;;  %v2131_v18 = vpop.f32.mrb[7].mxu1 }
 0x107   : > { %v2132_v19 = vadd.f32 %v2131_v18, %v2130_v14 }
 0x108   : > { %v1100_v20 = vadd.f32 %v2068_v17, %v2836_v52  ;;  %v2855_v21 = vadd.f32 %v2129_v13, %v1097_v16 }
 0x10a   : > { %v2860_v23 = vadd.f32 %v2132_v19, %v1100_v20  ;;  %v2069_v24 = vpop.f32.mrb[8].mxu0 }
 0x10b   : > { %v2070_v25 = vpop.f32.mrb[9].mxu0  ;;  %v2133_v26 = vpop.f32.mrb[8].mxu1 }
 0x10c   : > { %v2071_v27 = vadd.f32 %v2070_v25, %v2069_v24  ;;  %v2072_v28 = vpop.f32.mrb[10].mxu0  ;;  %v2134_v29 = vpop.f32.mrb[9].mxu1 }
 0x10d   : > { %v2073_v30 = vpop.f32.mrb[11].mxu0  ;;  %v2135_v31 = vadd.f32 %v2134_v29, %v2133_v26  ;;  %v2136_v32 = vpop.f32.mrb[10].mxu1 }
 0x10e   : > { %v1105_v33 = vadd.f32 %v2071_v27, %v2836_v52  ;;  %v2074_v34 = vadd.f32 %v2073_v30, %v2072_v28  ;;  %v2137_v35 = vpop.f32.mrb[11].mxu1 }
 0x10f   : > { %v2138_v36 = vadd.f32 %v2137_v35, %v2136_v32 }
 0x110   : > { %v1108_v37 = vadd.f32 %v2074_v34, %v2836_v52  ;;  %v2864_v38 = vadd.f32 %v2135_v31, %v1105_v33 }
 0x112   : > { %v2866_v39 = vadd.f32 %v2138_v36, %v1108_v37  ;;  %v2075_v40 = vpop.f32.mrb[12].mxu0 }
 0x113   : > { %v2076_v41 = vpop.f32.mrb[13].mxu0  ;;  %v2139_v42 = vpop.f32.mrb[12].mxu1 }
 0x114   : > { %v2077_v43 = vadd.f32 %v2076_v41, %v2075_v40  ;;  %v2078_v44 = vpop.f32.mrb[14].mxu0  ;;  %v2140_v45 = vpop.f32.mrb[13].mxu1 }
 0x115   : > { %v2079_v46 = vpop.f32.mrb[15].mxu0  ;;  %v2141_v47 = vadd.f32 %v2140_v45, %v2139_v42  ;;  %v2142_v48 = vpop.f32.mrb[14].mxu1 }
 0x116   : > { %v1113_v49 = vadd.f32 %v2077_v43, %v2836_v52  ;;  %v2080_v50 = vadd.f32 %v2079_v46, %v2078_v44  ;;  %v2143_v51 = vpop.f32.mrb[15].mxu1 }
 0x117   : > { %v2144_v53 = vadd.f32 %v2143_v51, %v2142_v48 }
 0x118   : > { %v1116_v54 = vadd.f32 %v2080_v50, %v2836_v52  ;;  %v2870_v55 = vadd.f32 %v2141_v47, %v1113_v49 }
 0x11a   : > { %v2872_v56 = vadd.f32 %v2144_v53, %v1116_v54  ;;  %v2081_v57 = vpop.f32.mrb[16].mxu0 }
 0x11b   : > { %v2082_v58 = vpop.f32.mrb[17].mxu0  ;;  %v2145_v59 = vpop.f32.mrb[16].mxu1 }
 0x11c   : > { %v2083_v60 = vadd.f32 %v2082_v58, %v2081_v57  ;;  %v2084_v61 = vpop.f32.mrb[18].mxu0  ;;  %v2146_v62 = vpop.f32.mrb[17].mxu1 }
 0x11d   : > { %v2085_v63 = vpop.f32.mrb[19].mxu0  ;;  %v2147_v0 = vadd.f32 %v2146_v62, %v2145_v59  ;;  %v2148_v1 = vpop.f32.mrb[18].mxu1 }
 0x11e   : > { %v1121_v2 = vadd.f32 %v2083_v60, %v2836_v52  ;;  %v2086_v4 = vadd.f32 %v2085_v63, %v2084_v61  ;;  %v2149_v6 = vpop.f32.mrb[19].mxu1 }
 0x11f   : > { %v2150_v7 = vadd.f32 %v2149_v6, %v2148_v1 }
 0x120   : > { %v1124_v8 = vadd.f32 %v2086_v4, %v2836_v52  ;;  %v2876_v9 = vadd.f32 %v2147_v0, %v1121_v2 }
 0x122   : > { %v2878_v10 = vadd.f32 %v2150_v7, %v1124_v8  ;;  %v2087_v11 = vpop.f32.mrb[20].mxu0 }
 0x123   : > { %v2088_v12 = vpop.f32.mrb[21].mxu0  ;;  %v2151_v13 = vpop.f32.mrb[20].mxu1 }
 0x124   : > { %v2089_v14 = vadd.f32 %v2088_v12, %v2087_v11  ;;  %v2090_v15 = vpop.f32.mrb[22].mxu0  ;;  %v2152_v16 = vpop.f32.mrb[21].mxu1 }
 0x125   : > { %v2091_v17 = vpop.f32.mrb[23].mxu0  ;;  %v2153_v18 = vadd.f32 %v2152_v16, %v2151_v13  ;;  %v2154_v19 = vpop.f32.mrb[22].mxu1 }
 0x126   : > { %v1129_v20 = vadd.f32 %v2089_v14, %v2836_v52  ;;  %v2092_v22 = vadd.f32 %v2091_v17, %v2090_v15  ;;  %v2155_v24 = vpop.f32.mrb[23].mxu1 }
 0x127   : > { %v2156_v25 = vadd.f32 %v2155_v24, %v2154_v19 }
 0x128   : > { %v1132_v26 = vadd.f32 %v2092_v22, %v2836_v52  ;;  %v2882_v27 = vadd.f32 %v2153_v18, %v1129_v20 }
 0x12a   : > { %v2884_v28 = vadd.f32 %v2156_v25, %v1132_v26  ;;  %v2093_v29 = vpop.f32.mrb[24].mxu0 }
 0x12b   : > { %v2094_v30 = vpop.f32.mrb[25].mxu0  ;;  %v2157_v31 = vpop.f32.mrb[24].mxu1 }
 0x12c   : > { %v2095_v32 = vadd.f32 %v2094_v30, %v2093_v29  ;;  %v2096_v33 = vpop.f32.mrb[26].mxu0  ;;  %v2158_v34 = vpop.f32.mrb[25].mxu1 }
 0x12d   : > { %v2097_v35 = vpop.f32.mrb[27].mxu0  ;;  %v2159_v36 = vadd.f32 %v2158_v34, %v2157_v31  ;;  %v2160_v37 = vpop.f32.mrb[26].mxu1 }
 0x12e   : > { %v1137_v40 = vadd.f32 %v2095_v32, %v2836_v52  ;;  %v2098_v41 = vadd.f32 %v2097_v35, %v2096_v33  ;;  %v2161_v42 = vpop.f32.mrb[27].mxu1 }
 0x12f   : > { %v2162_v43 = vadd.f32 %v2161_v42, %v2160_v37 }
 0x130   : > { %v1140_v44 = vadd.f32 %v2098_v41, %v2836_v52  ;;  %v1234_v45 = vadd.f32 %v2159_v36, %v1137_v40 }
 0x132   : > { %v1237_v46 = vadd.f32 %v2162_v43, %v1140_v44  ;;  %v2099_v47 = vpop.f32.mrb[28].mxu0 }
 0x133   : > { %v2100_v48 = vpop.f32.mrb[29].mxu0  ;;  %v2163_v49 = vpop.f32.mrb[28].mxu1 }
 0x134   : > { %v2101_v50 = vadd.f32 %v2100_v48, %v2099_v47  ;;  %v2102_v51 = vpop.f32.mrb[30].mxu0  ;;  %v2164_v53 = vpop.f32.mrb[29].mxu1 }
 0x135   : > { %v2103_v54 = vpop.f32.mrb[31].mxu0  ;;  %v2165_v57 = vadd.f32 %v2164_v53, %v2163_v49  ;;  %v2166_v58 = vpop.f32.mrb[30].mxu1 }
 0x136   : > { %v1145_v59 = vadd.f32 %v2101_v50, %v2836_v52  ;;  %v2104_v60 = vadd.f32 %v2103_v54, %v2102_v51  ;;  %v2167_v61 = vpop.f32.mrb[31].mxu1 }
 0x137   : > { %v2168_v62 = vadd.f32 %v2167_v61, %v2166_v58 }
 0x138   : > { %v1148_v63 = vadd.f32 %v2104_v60, %v2836_v52  ;;  %v1242_v0 = vadd.f32 %v2165_v57, %v1145_v59 }
 0x13a   : > { %v1245_v1 = vadd.f32 %v2168_v62, %v1148_v63  ;;  %v2185_v2 = vpop.f32.mrb[32].mxu0 }
 0x13b   : > { %v2221_v4 = vpop.f32.mrb[32].mxu1  ;;  %v2186_v6 = vpop.f32.mrb[33].mxu0 }
 0x13c   : > { %v2187_v7 = vadd.f32 %v2186_v6, %v2185_v2  ;;  %v2222_v8 = vpop.f32.mrb[33].mxu1  ;;  %v2188_v11 = vpop.f32.mrb[34].mxu0 }
 0x13d   : > { %v2223_v12 = vadd.f32 %v2222_v8, %v2221_v4  ;;  %v2224_v13 = vpop.f32.mrb[34].mxu1  ;;  %v2189_v14 = vpop.f32.mrb[35].mxu0 }
 0x13e   : > { %v2190_v15 = vadd.f32 %v2189_v14, %v2188_v11  ;;  %v2225_v16 = vpop.f32.mrb[35].mxu1  ;;  %v1283_v17 = vadd.f32 %v2187_v7, %v2843_v3 }
 0x13f   : > { %v2226_v18 = vadd.f32 %v2225_v16, %v2224_v13  ;;  %v2891_v19 = vadd.f32 %v2223_v12, %v1234_v45 }
 0x140   : > { %v1286_v52 = vadd.f32 %v2190_v15, %v2848_v5 }
 0x141   : > { %v2894_v20 = vadd.f32 %v2226_v18, %v1237_v46 }
 0x142   : > { %v2191_v22 = vpop.f32.mrb[36].mxu0 }
 0x143   : > { %v2227_v24 = vpop.f32.mrb[36].mxu1  ;;  %v2192_v25 = vpop.f32.mrb[37].mxu0 }
 0x144   : > { %v2193_v26 = vadd.f32 %v2192_v25, %v2191_v22  ;;  %v2228_v29 = vpop.f32.mrb[37].mxu1  ;;  %v2194_v30 = vpop.f32.mrb[38].mxu0 }
 0x145   : > { %v2229_v31 = vadd.f32 %v2228_v29, %v2227_v24  ;;  %v2230_v32 = vpop.f32.mrb[38].mxu1  ;;  %v2195_v33 = vpop.f32.mrb[39].mxu0 }
 0x146   : > { %v2196_v34 = vadd.f32 %v2195_v33, %v2194_v30  ;;  %v2231_v35 = vpop.f32.mrb[39].mxu1  ;;  %v1291_v3 = vadd.f32 %v2193_v26, %v2855_v21 }
 0x147   : > { %v2232_v36 = vadd.f32 %v2231_v35, %v2230_v32  ;;  %v2897_v37 = vadd.f32 %v2229_v31, %v1242_v0 }
 0x148   : > { %v1294_v5 = vadd.f32 %v2196_v34, %v2860_v23 }
 0x149   : > { %v2900_v40 = vadd.f32 %v2232_v36, %v1245_v1 }
 0x14a   : > { %v2197_v41 = vpop.f32.mrb[40].mxu0 }
 0x14b   : > { %v2278_v42 = vpop.f32.mrb[40].mxu1  ;;  %v2198_v43 = vpop.f32.mrb[41].mxu0 }
 0x14c   : > { %v1388_v44 = vadd.f32 %v2278_v42, %v1291_v3  ;;  %v2199_v45 = vadd.f32 %v2198_v43, %v2197_v41  ;;  %v1379_v46 = vpop.f32.mrb[41].mxu1  ;;  %v2200_v47 = vpop.f32.mrb[42].mxu0 }
 0x14d   : > { %v1380_v48 = vadd.f32 %v1379_v46, %v1283_v17  ;;  %v2279_v49 = vpop.f32.mrb[42].mxu1  ;;  %v2201_v50 = vpop.f32.mrb[43].mxu0 }
 0x14e   : > { %v1391_v51 = vadd.f32 %v2279_v49, %v1294_v5  ;;  %v2202_v53 = vadd.f32 %v2201_v50, %v2200_v47  ;;  %v1382_v21 = vpop.f32.mrb[43].mxu1  ;;  %v1299_v54 = vadd.f32 %v2199_v45, %v2864_v38  ;;  %v1444_v58 = vmax.f32 %v1388_v44, 0.0 }
 0x14f   : > { %v1383_v57 = vadd.f32 %v1382_v21, %v1286_v52  ;;  %v1442_v60 = vmax.f32 %v1380_v48, 0.0 }
 0x150   : > { %v1445_v23 = vmax.f32 %v1391_v51, 0.0  ;;  %v1302_v59 = vadd.f32 %v2202_v53, %v2866_v39 }
 0x151   : > { %v1443_v61 = vmax.f32 %v1383_v57, 0.0 }
 0x152   : > { %v1459_v62 = vpack.c.bf16 %v1445_v23, %v1444_v58  ;;  %v2203_v63 = vpop.f32.mrb[44].mxu0 }
 0x153   : > { %v1458_v0 = vpack.c.bf16 %v1443_v61, %v1442_v60  ;;  %v2282_v1 = vpop.f32.mrb[44].mxu1  ;;  %v2204_v2 = vpop.f32.mrb[45].mxu0 }
 0x154   : > { %v2205_v4 = vadd.f32 %v2204_v2, %v2203_v63  ;;  %v1395_v6 = vpop.f32.mrb[45].mxu1  ;;  %v2206_v7 = vpop.f32.mrb[46].mxu0 }
 0x155   : > { %v1396_v8 = vadd.f32 %v1395_v6, %v1299_v54  ;;  %v2283_v11 = vpop.f32.mrb[46].mxu1  ;;  %2308 = vmatprep.mubr.bf16.mxu1 %v1458_v0  ;;  %v2207_v12 = vpop.f32.mrb[47].mxu0 }
 0x156   : > { %v1307_v38 = vadd.f32 %v2205_v4, %v2870_v55  ;;  %v2208_v13 = vadd.f32 %v2207_v12, %v2206_v7  ;;  %v1398_v14 = vpop.f32.mrb[47].mxu1  ;;  %2309 = vmatmul.mubr.bf16.vlgmr.msra.gmra.mrb[56].mxu1 %v1459_v62 }
 0x157   : > { %v1399_v39 = vadd.f32 %v1398_v14, %v1302_v59  ;;  %v1446_v17 = vmax.f32 %v1396_v8, 0.0 }
 0x158   : > { %v1404_v15 = vadd.f32 %v2282_v1, %v1307_v38  ;;  %v1310_v16 = vadd.f32 %v2208_v13, %v2872_v56 }
 0x159   : > { %v1447_v18 = vmax.f32 %v1399_v39, 0.0 }
 0x15a   : > { %v1407_v52 = vadd.f32 %v2283_v11, %v1310_v16  ;;  %v2209_v22 = vpop.f32.mrb[48].mxu0  ;;  %v1448_v29 = vmax.f32 %v1404_v15, 0.0 }
 0x15b   : > { %v1460_v24 = vpack.c.bf16 %v1447_v18, %v1446_v17  ;;  %v2210_v25 = vpop.f32.mrb[49].mxu0  ;;  %v2286_v26 = vpop.f32.mrb[48].mxu1 }
 0x15c   : > { %v1449_v30 = vmax.f32 %v1407_v52, 0.0  ;;  %v2211_v31 = vadd.f32 %v2210_v25, %v2209_v22  ;;  %v2212_v32 = vpop.f32.mrb[50].mxu0  ;;  %v1411_v33 = vpop.f32.mrb[49].mxu1 }
 0x15d   : > { %2312 = vmatprep.mubr.bf16.mxu1 %v1460_v24  ;;  %v2213_v55 = vpop.f32.mrb[51].mxu0  ;;  %v2287_v34 = vpop.f32.mrb[50].mxu1 }
 0x15e   : > { %v2214_v35 = vadd.f32 %v2213_v55, %v2212_v32  ;;  %v1315_v3 = vadd.f32 %v2211_v31, %v2876_v9  ;;  %v1461_v36 = vpack.c.bf16 %v1449_v30, %v1448_v29  ;;  %v1414_v56 = vpop.f32.mrb[51].mxu1 }
 0x160   : > { %v1412_v5 = vadd.f32 %v1411_v33, %v1315_v3  ;;  %2313 = vmatmul.mubr.bf16.gmra.mrb[60].mxu1 %v1461_v36  ;;  %v1318_v41 = vadd.f32 %v2214_v35, %v2878_v10 }
 0x162   : > { %v1415_v42 = vadd.f32 %v1414_v56, %v1318_v41  ;;  %v2215_v43 = vpop.f32.mrb[52].mxu0  ;;  %v1450_v46 = vmax.f32 %v1412_v5, 0.0 }
 0x163   : > { %v2290_v44 = vpop.f32.mrb[52].mxu1  ;;  %v2216_v45 = vpop.f32.mrb[53].mxu0 }
 0x164   : > { %v1451_v47 = vmax.f32 %v1415_v42, 0.0  ;;  %v1436_v48 = vadd.f32 %v2290_v44, %v2897_v37  ;;  %v2217_v49 = vadd.f32 %v2216_v45, %v2215_v43  ;;  %v1427_v50 = vpop.f32.mrb[53].mxu1  ;;  %v2218_v51 = vpop.f32.mrb[54].mxu0 }
 0x165   : > { %v1428_v53 = vadd.f32 %v1427_v50, %v2891_v19  ;;  %v2291_v9 = vpop.f32.mrb[54].mxu1  ;;  %v2219_v21 = vpop.f32.mrb[55].mxu0 }
 0x166   : > { %v1462_v54 = vpack.c.bf16 %v1451_v47, %v1450_v46  ;;  %v1323_v57 = vadd.f32 %v2217_v49, %v2882_v27  ;;  %v1439_v10 = vadd.f32 %v2291_v9, %v2900_v40  ;;  %v1430_v58 = vpop.f32.mrb[55].mxu1  ;;  %v2220_v23 = vadd.f32 %v2219_v21, %v2218_v51  ;;  %v2021_v40 = vld [vmem:[%s2955_s4] ss:$0 sm:$0xff] }
 0x167   : > { %v1431_v59 = vadd.f32 %v1430_v58, %v2894_v20  ;;  %v1456_v60 = vmax.f32 %v1436_v48, 0.0  ;;  %v1454_v37 = vmax.f32 %v1428_v53, 0.0  ;;  %v2524_v20 = vld [vmem:[%s2956_s5 + $0x30] sm:$0xff]  }
 0x168   : > { %v1420_v61 = vadd.f32 %v2286_v26, %v1323_v57  ;;  %v1457_v62 = vmax.f32 %v1439_v10, 0.0  ;;  %2316 = vmatprep.mubr.bf16.mxu1 %v1462_v54  ;;  %v1326_v63 = vadd.f32 %v2220_v23, %v2884_v28  ;;  %2336 = vmatprep.subr.bf16.mxu0 %v2524_v20  ;;  %v2525_v28 = vld [vmem:[%s2956_s5 + $0x38] sm:$0xff]  }
 0x169   : > { %v1455_v0 = vmax.f32 %v1431_v59, 0.0  ;;  %2337 = vmatpush3.bf16.msra.mxu0 %v2524_v20 }
 0x16a   : > { %v1465_v19 = vpack.c.bf16 %v1457_v62, %v1456_v60  ;;  %v1423_v1 = vadd.f32 %v2287_v34, %v1326_v63  ;;  %v1452_v4 = vmax.f32 %v1420_v61, 0.0  ;;  %2338 = vmatprep.subr.bf16.mxu0 %v2525_v28 }
 0x16b   : > { %v1464_v2 = vpack.c.bf16 %v1455_v0, %v1454_v37 }
 0x16c   : > { %v1453_v6 = vmax.f32 %v1423_v1, 0.0  ;;  %v2030_v1 = vld [vmem:[%s2957_s6] ss:$0 sm:$0xff] }
 0x16d   : > { %2339 = vmatpush3.bf16.msra.mxu0 %v2525_v28 }
 0x16e   : > { %v1463_v27 = vpack.c.bf16 %v1453_v6, %v1452_v4 }
 0x170   : > { %2317 = vmatmul.mubr.bf16.gmra.mrb[64].mxu1 %v1463_v27 }
 0x171   : > { %2320 = vmatprep.mubr.bf16.mxu1 %v1464_v2 }
 0x178   : > { %2321 = vmatmul.mubr.bf16.gmra.mrb[68].mxu1 %v1465_v19 }
 0x229   : > { %v2310_v7 = vpop.f32.mrb[56].mxu1 }
 0x22a   : > { %v1580_v8 = vadd.f32 %v2310_v7, %v2021_v40  ;;  %v1571_v11 = vpop.f32.mrb[57].mxu1 }
 0x22b   : > { %v1572_v12 = vadd.f32 %v2021_v40, %v1571_v11  ;;  %v2311_v38 = vpop.f32.mrb[58].mxu1 }
 0x22c   : > { %v1583_v13 = vadd.f32 %v2311_v38, %v2021_v40  ;;  %v1574_v14 = vpop.f32.mrb[59].mxu1  ;;  %v1636_v15 = vmax.f32 %v1580_v8, 0.0 }
 0x22d   : > { %v1575_v39 = vadd.f32 %v2021_v40, %v1574_v14  ;;  %v1634_v17 = vmax.f32 %v1572_v12, 0.0 }
 0x22e   : > { %v1637_v16 = vmax.f32 %v1583_v13, 0.0 }
 0x22f   : > { %v1635_v18 = vmax.f32 %v1575_v39, 0.0 }
 0x230   : > { %v1651_v52 = vpack.c.bf16 %v1637_v16, %v1636_v15 }
 0x231   : > { %v1650_v22 = vpack.c.bf16 %v1635_v18, %v1634_v17 }
 0x233   : > { %2340 = vmatprep.mubr.bf16.mxu0 %v1650_v22  ;;  %v2314_v24 = vpop.f32.mrb[60].mxu1 }
 0x234   : > { %v1596_v25 = vadd.f32 %v2314_v24, %v2021_v40  ;;  %2341 = vmatmul.mubr.bf16.vlgmr.msra.gmra.mrb[56].mxu0 %v1651_v52  ;;  %v1587_v26 = vpop.f32.mrb[61].mxu1 }
 0x235   : > { %v1588_v29 = vadd.f32 %v2021_v40, %v1587_v26  ;;  %v2315_v30 = vpop.f32.mrb[62].mxu1 }
 0x236   : > { %v1599_v31 = vadd.f32 %v2315_v30, %v2021_v40  ;;  %v1590_v32 = vpop.f32.mrb[63].mxu1  ;;  %v1640_v55 = vmax.f32 %v1596_v25, 0.0 }
 0x237   : > { %v1591_v33 = vadd.f32 %v2021_v40, %v1590_v32  ;;  %v1638_v35 = vmax.f32 %v1588_v29, 0.0 }
 0x238   : > { %v1641_v34 = vmax.f32 %v1599_v31, 0.0 }
 0x239   : > { %v1639_v3 = vmax.f32 %v1591_v33, 0.0 }
 0x23a   : > { %v1653_v36 = vpack.c.bf16 %v1641_v34, %v1640_v55 }
 0x23b   : > { %v1652_v56 = vpack.c.bf16 %v1639_v3, %v1638_v35 }
 0x23d   : > { %2344 = vmatprep.mubr.bf16.mxu0 %v1652_v56 }
 0x23e   : > { %2345 = vmatmul.mubr.bf16.gmra.mrb[60].mxu0 %v1653_v36 }
 0x243   : > { %v2318_v5 = vpop.f32.mrb[64].mxu1 }
 0x244   : > { %v1612_v41 = vadd.f32 %v2318_v5, %v2021_v40  ;;  %v1603_v42 = vpop.f32.mrb[65].mxu1 }
 0x245   : > { %v1604_v43 = vadd.f32 %v2021_v40, %v1603_v42  ;;  %v2319_v44 = vpop.f32.mrb[66].mxu1 }
 0x246   : > { %v1615_v45 = vadd.f32 %v2319_v44, %v2021_v40  ;;  %v1606_v46 = vpop.f32.mrb[67].mxu1  ;;  %v1644_v48 = vmax.f32 %v1612_v41, 0.0 }
 0x247   : > { %v1607_v47 = vadd.f32 %v2021_v40, %v1606_v46  ;;  %v1642_v50 = vmax.f32 %v1604_v43, 0.0 }
 0x248   : > { %v1645_v49 = vmax.f32 %v1615_v45, 0.0 }
 0x249   : > { %v1643_v51 = vmax.f32 %v1607_v47, 0.0 }
 0x24a   : > { %v1655_v53 = vpack.c.bf16 %v1645_v49, %v1644_v48 }
 0x24b   : > { %v1654_v9 = vpack.c.bf16 %v1643_v51, %v1642_v50  ;;  %v2322_v21 = vpop.f32.mrb[68].mxu1 }
 0x24c   : > { %v1628_v54 = vadd.f32 %v2322_v21, %v2021_v40  ;;  %v1619_v57 = vpop.f32.mrb[69].mxu1 }
 0x24d   : > { %v1620_v10 = vadd.f32 %v2021_v40, %v1619_v57  ;;  %v2323_v58 = vpop.f32.mrb[70].mxu1  ;;  %2348 = vmatprep.mubr.bf16.mxu0 %v1654_v9 }
 0x24e   : > { %v1631_v23 = vadd.f32 %v2323_v58, %v2021_v40  ;;  %v1622_v59 = vpop.f32.mrb[71].mxu1  ;;  %2349 = vmatmul.mubr.bf16.gmra.mrb[64].mxu0 %v1655_v53  ;;  %v1648_v61 = vmax.f32 %v1628_v54, 0.0 }
 0x24f   : > { %v1623_v60 = vadd.f32 %v2021_v40, %v1622_v59  ;;  %v1646_v37 = vmax.f32 %v1620_v10, 0.0 }
 0x250   : > { %v1649_v62 = vmax.f32 %v1631_v23, 0.0 }
 0x251   : > { %v1647_v63 = vmax.f32 %v1623_v60, 0.0 }
 0x252   : > { %v1657_v0 = vpack.c.bf16 %v1649_v62, %v1648_v61 }
 0x253   : > { %v1656_v19 = vpack.c.bf16 %v1647_v63, %v1646_v37 }
 0x255   : > { %2352 = vmatprep.mubr.bf16.mxu0 %v1656_v19 }
 0x256   : > { %2353 = vmatmul.mubr.bf16.gmra.mrb[68].mxu0 %v1657_v0 }
 0x307   : > { %v2342_v2 = vpop.f32.mrb[56].mxu0 }
 0x308   : > { %v1772_v4 = vadd.f32 %v2342_v2, %v2030_v1  ;;  %v1763_v6 = vpop.f32.mrb[57].mxu0 }
 0x309   : > { %v1764_v27 = vadd.f32 %v2030_v1, %v1763_v6  ;;  %v2343_v20 = vpop.f32.mrb[58].mxu0 }
 0x30a   : > { %1828 = vst [vmem:[%s2930_s21 + $0x10] sm:$0xff] %v1772_v4  ;;  %v1775_v28 = vadd.f32 %v2343_v20, %v2030_v1  ;;  %v1766_v40 = vpop.f32.mrb[59].mxu0 }
 0x30b   : > { %1826 = vst [vmem:[%s2930_s21] sm:$0xff] %v1764_v27  ;;  %v1767_v7 = vadd.f32 %v2030_v1, %v1766_v40 }
 0x30c   : > { %1829 = vst [vmem:[%s2930_s21 + $0x18] sm:$0xff] %v1775_v28 }
 0x30d   : > { %1827 = vst [vmem:[%s2930_s21 + $0x8] sm:$0xff] %v1767_v7 }
 0x311   : > { %v2346_v8 = vpop.f32.mrb[60].mxu0 }
 0x312   : > { %v1788_v11 = vadd.f32 %v2346_v8, %v2030_v1  ;;  %v1779_v12 = vpop.f32.mrb[61].mxu0 }
 0x313   : > { %v1780_v38 = vadd.f32 %v2030_v1, %v1779_v12  ;;  %v2347_v13 = vpop.f32.mrb[62].mxu0 }
 0x314   : > { %1832 = vst [vmem:[%s2930_s21 + $0x30] sm:$0xff] %v1788_v11  ;;  %v1791_v14 = vadd.f32 %v2347_v13, %v2030_v1  ;;  %v1782_v39 = vpop.f32.mrb[63].mxu0 }
 0x315   : > { %1830 = vst [vmem:[%s2930_s21 + $0x20] sm:$0xff] %v1780_v38  ;;  %v1783_v15 = vadd.f32 %v2030_v1, %v1782_v39 }
 0x316   : > { %1833 = vst [vmem:[%s2930_s21 + $0x38] sm:$0xff] %v1791_v14 }
 0x317   : > { %1831 = vst [vmem:[%s2930_s21 + $0x28] sm:$0xff] %v1783_v15 }
 0x321   : > { %v2350_v16 = vpop.f32.mrb[64].mxu0 }
 0x322   : > { %v1804_v17 = vadd.f32 %v2350_v16, %v2030_v1  ;;  %v1795_v18 = vpop.f32.mrb[65].mxu0 }
 0x323   : > { %v1796_v52 = vadd.f32 %v2030_v1, %v1795_v18  ;;  %v2351_v22 = vpop.f32.mrb[66].mxu0 }
 0x324   : > { %1836 = vst [vmem:[%s2930_s21 + $0x50] sm:$0xff] %v1804_v17  ;;  %v1807_v24 = vadd.f32 %v2351_v22, %v2030_v1  ;;  %v1798_v25 = vpop.f32.mrb[67].mxu0 }
 0x325   : > { %1834 = vst [vmem:[%s2930_s21 + $0x40] sm:$0xff] %v1796_v52  ;;  %v1799_v26 = vadd.f32 %v2030_v1, %v1798_v25 }
 0x326   : > { %1837 = vst [vmem:[%s2930_s21 + $0x58] sm:$0xff] %v1807_v24 }
 0x327   : > { %1835 = vst [vmem:[%s2930_s21 + $0x48] sm:$0xff] %v1799_v26 }
 0x329   : > { %v2354_v29 = vpop.f32.mrb[68].mxu0 }
 0x32a   : > { %v1820_v30 = vadd.f32 %v2354_v29, %v2030_v1  ;;  %v1811_v31 = vpop.f32.mrb[69].mxu0 }
 0x32b   : > { %v1812_v32 = vadd.f32 %v2030_v1, %v1811_v31  ;;  %v2355_v33 = vpop.f32.mrb[70].mxu0 }
 0x32c   : > { %1840 = vst [vmem:[%s2930_s21 + $0x70] sm:$0xff] %v1820_v30  ;;  %v1823_v55 = vadd.f32 %v2355_v33, %v2030_v1  ;;  %v1814_v34 = vpop.f32.mrb[71].mxu0 }
 0x32d   : > { %1838 = vst [vmem:[%s2930_s21 + $0x60] sm:$0xff] %v1812_v32  ;;  %v1815_v35 = vadd.f32 %v2030_v1, %v1814_v34 }
 0x32e   : > { %1841 = vst [vmem:[%s2930_s21 + $0x78] sm:$0xff] %v1823_v55 }
 0x32f   : > { %1839 = vst [vmem:[%s2930_s21 + $0x68] sm:$0xff] %v1815_v35 }
 0x330 PF: > { %s17_s24 = sadd.s32 1, %s2532_s24  }
 0x331   : > { %p14_p4 = scmp.ge.s32.totalorder %s17_s24, 4  }
 0x333   :  { %16 = sbr.rel (!%p14_p4) target bundleno = 1 (0x1), region = 78 }

</bundles_post_ra>
